<compile_context>
chip_gen: v5e
topology: v5e:2x2
jax: 0.10.0
libtpu: 0.0.40
codegen_flags: <defaults>
</compile_context>

<pallas_src>
import functools
import math

import jax
import jax.numpy as jnp
from jax.experimental import pallas as pl
from jax.experimental.pallas import tpu as pltpu

LANE = 128
SUBLANE = 8


def _round_up(x, m):
    return (x + m - 1) // m * m


def _vmem_capacity():
    try:
        info = pltpu.get_tpu_info()
        return int(getattr(info, "vmem_capacity_bytes", 64 * 1024 * 1024))
    except Exception:
        return 64 * 1024 * 1024  # conservative default (v7x per-TC VMEM)


def _single_buffered_spec(shape, index_map):
    """BlockSpec for a constant-index block: one VMEM buffer instead of two."""
    try:
        return pl.BlockSpec(shape, index_map, pipeline_mode=pl.Buffered(1))
    except Exception:
        return pl.BlockSpec(shape, index_map)


def _row_plan(rows, block_rows, row_align):
    """Pick the row tile tm (multiple of row_align) minimizing padding waste,
    with >= 2 row tiles when possible so the parallel axis can shard across
    two TensorCores (v7x)."""
    n_tiles = max(1, -(-rows // block_rows))
    if n_tiles == 1 and rows > row_align:
        n_tiles = 2
    tm = _round_up(-(-rows // n_tiles), row_align)
    n_tiles = -(-rows // tm)
    rows_pad = tm * n_tiles
    return tm, rows_pad, n_tiles


def _vmem_footprint(tm, tn, k_pad, h_pad, mdt, outb):
    """Approximate VMEM bytes used by the pipeline buffers + scratch."""
    return (2 * tm * k_pad * mdt        # x row tile (double-buffered)
            + 1 * k_pad * h_pad * mdt   # W0 (single-buffered, constant index)
            + 1 * h_pad * 4             # b0 (single-buffered)
            + 2 * k_pad * tn * mdt      # Wr column tile
            + 2 * h_pad * tn * mdt      # W1 column tile
            + 3 * 2 * tn * 4            # br / b1 / gamma tiles
            + 2 * tm * tn * outb        # output tile
            + tm * h_pad * mdt)         # h0 scratch


def _resnet_dense_kernel(x_ref, w0_ref, b0_ref, wr_ref, br_ref, w1_ref, b1_ref,
                         gamma_ref, o_ref, h0_sc):
    n = pl.program_id(1)

    # Layer-0 once per row tile (full hidden width): h0 = SiLU(x @ W0 + b0).
    @pl.when(n == 0)
    def _():
        h0 = jnp.dot(x_ref[...], w0_ref[...], preferred_element_type=jnp.float32)
        h0 = h0 + b0_ref[...]
        h0_sc[...] = (h0 * jax.nn.sigmoid(h0)).astype(h0_sc.dtype)  # SiLU

    # Per hidden-column tile: residual inline, layer-1, SiLU, LayerScale, add.
    res = jnp.dot(x_ref[...], wr_ref[...], preferred_element_type=jnp.float32)
    res = res + br_ref[...]
    h = jnp.dot(h0_sc[...], w1_ref[...], preferred_element_type=jnp.float32)
    h = h + b1_ref[...]
    h = h * jax.nn.sigmoid(h)                                       # SiLU
    o_ref[...] = (res + gamma_ref[...] * h).astype(o_ref.dtype)


def prepare_params(params, matmul_dtype=jnp.float32):
    """Pad feature dims lane-dense and cast matmul operands ONCE (hoisted out
    of the per-call path). Biases / gamma stay f32 (added to f32 accumulator)."""
    wr, br, w0, b0, w1, b1, gamma = params
    input_size, hidden_size = wr.shape
    k_pad = _round_up(input_size, LANE)
    col_align = 2 * LANE if hidden_size > LANE else LANE  # 256-friendly on v6e/v7x
    h_pad = _round_up(hidden_size, col_align)

    def pad2(a, r, c):
        return jnp.pad(a, ((0, r - a.shape[0]), (0, c - a.shape[1])))

    w0_p = pad2(w0, k_pad, h_pad).astype(matmul_dtype)
    wr_p = pad2(wr, k_pad, h_pad).astype(matmul_dtype)
    w1_p = pad2(w1, h_pad, h_pad).astype(matmul_dtype)
    b0_p = pad2(b0.reshape(1, -1).astype(jnp.float32), 1, h_pad)
    br_p = pad2(br.reshape(1, -1).astype(jnp.float32), 1, h_pad)
    b1_p = pad2(b1.reshape(1, -1).astype(jnp.float32), 1, h_pad)
    gamma_p = pad2(gamma.reshape(1, -1).astype(jnp.float32), 1, h_pad)
    return (w0_p, b0_p, wr_p, br_p, w1_p, b1_p, gamma_p)


@functools.partial(jax.jit,
                   static_argnames=("hidden_size", "block_rows", "block_n"))
def resnet_dense_forward(x, prepared, hidden_size, block_rows=1024, block_n=512):
    """x: (..., input_size) -> (..., hidden_size). `prepared` = prepare_params(...)."""
    w0_p, b0_p, wr_p, br_p, w1_p, b1_p, gamma_p = prepared
    matmul_dtype = w0_p.dtype
    out_dtype = x.dtype
    k_pad, h_pad = w0_p.shape
    input_size = x.shape[-1]

    lead = x.shape[:-1]
    rows = math.prod(lead) if lead else 1

    mdt_size = jnp.dtype(matmul_dtype).itemsize
    out_size = jnp.dtype(out_dtype).itemsize
    row_align = SUBLANE if mdt_size >= 4 else 2 * SUBLANE  # bf16 packs 16 sublanes

    # Column tile: largest multiple of the MXU-friendly alignment that divides
    # h_pad and is <= block_n (h_pad is already a multiple of col_align).
    col_align = 2 * LANE if h_pad > LANE else LANE
    tn = col_align
    t = col_align
    while t <= min(block_n, h_pad):
        if h_pad % t == 0:
            tn = t
        t += col_align

    # Size row tile against the actual VMEM capacity of this generation.
    cap = _vmem_capacity()
    headroom = 8 * 1024 * 1024  # compiler internal scratch etc.
    br_lim = block_rows
    while True:
        tm, rows_pad, _ = _row_plan(rows, br_lim, row_align)
        fp = _vmem_footprint(tm, tn, k_pad, h_pad, mdt_size, out_size)
        if fp + headroom <= cap or tm <= row_align:
            break
        br_lim = max(row_align, br_lim // 2)
    vmem_limit = int(min(cap, max(fp + headroom, 16 * 1024 * 1024)))

    x2 = x.reshape(rows, input_size)
    x2 = jnp.pad(x2, ((0, rows_pad - rows), (0, k_pad - input_size)))
    x2 = x2.astype(matmul_dtype)

    grid = (rows_pad // tm, h_pad // tn)

    out = pl.pallas_call(
        _resnet_dense_kernel,
        out_shape=jax.ShapeDtypeStruct((rows_pad, h_pad), out_dtype),
        grid_spec=pltpu.PrefetchScalarGridSpec(
            num_scalar_prefetch=0,
            grid=grid,
            in_specs=[
                pl.BlockSpec((tm, k_pad), lambda i, n: (i, 0)),           # x rows
                _single_buffered_spec((k_pad, h_pad), lambda i, n: (0, 0)),  # W0
                _single_buffered_spec((1, h_pad), lambda i, n: (0, 0)),      # b0
                pl.BlockSpec((k_pad, tn), lambda i, n: (0, n)),           # Wr tile
                pl.BlockSpec((1, tn), lambda i, n: (0, n)),               # br tile
                pl.BlockSpec((h_pad, tn), lambda i, n: (0, n)),           # W1 tile
                pl.BlockSpec((1, tn), lambda i, n: (0, n)),               # b1 tile
                pl.BlockSpec((1, tn), lambda i, n: (0, n)),               # gamma tile
            ],
            out_specs=pl.BlockSpec((tm, tn), lambda i, n: (i, n)),
            scratch_shapes=[
                pltpu.VMEM((tm, h_pad), matmul_dtype),  # SiLU(layer-0) activations
            ],
        ),
        compiler_params=pltpu.CompilerParams(
            # row axis shards across TensorCores (megacore / v7x 2-TC);
            # column axis carries the n==0 scratch dependency -> arbitrary.
            dimension_semantics=("parallel", "arbitrary"),
            vmem_limit_bytes=vmem_limit,
        ),
    )(x2, w0_p, b0_p, wr_p, br_p, w1_p, b1_p, gamma_p)

    out = out[:rows, :hidden_size]
    return out.reshape(*lead, hidden_size)


def init_params(key, input_size, hidden_size, layer_scale_init=1.0,
                dtype=jnp.float32):
    """Deterministic synthetic parameters (shapes match the PyTorch module).
    Weights are stored (in, out), i.e. already transposed vs. torch."""
    ks = jax.random.split(key, 6)
    s_r = 1.0 / jnp.sqrt(input_size)
    s_0 = 1.0 / jnp.sqrt(input_size)
    s_1 = 1.0 / jnp.sqrt(hidden_size)
    wr = jax.random.uniform(ks[0], (input_size, hidden_size), dtype, -s_r, s_r)
    br = jax.random.uniform(ks[1], (1, hidden_size), dtype, -s_r, s_r)
    w0 = jax.random.uniform(ks[2], (input_size, hidden_size), dtype, -s_0, s_0)
    b0 = jax.random.uniform(ks[3], (1, hidden_size), dtype, -s_0, s_0)
    w1 = jax.random.uniform(ks[4], (hidden_size, hidden_size), dtype, -s_1, s_1)
    b1 = jax.random.uniform(ks[5], (1, hidden_size), dtype, -s_1, s_1)
    gamma = jnp.full((1, hidden_size), layer_scale_init, dtype)
    return (wr, br, w0, b0, w1, b1, gamma)


def resnet_dense_ref(x, params):
    """Pure-JAX reference mirroring the PyTorch forward (dropout=0.0)."""
    wr, br, w0, b0, w1, b1, gamma = params
    residual = x @ wr + br
    h = x @ w0 + b0
    h = h * jax.nn.sigmoid(h)
    h = h @ w1 + b1
    h = h * jax.nn.sigmoid(h)
    return residual + gamma * h


if __name__ == "__main__":
    key = jax.random.PRNGKey(0)
    kx, kp, kp2 = jax.random.split(key, 3)

    # Small shapes consistent with the module: (batch, seq, input) -> (batch, seq, hidden)
    input_size, hidden_size = 32, 32
    batch, seq = 2, 8
    x = jax.random.normal(kx, (batch, seq, input_size), jnp.float32)
    params = init_params(kp, input_size, hidden_size, layer_scale_init=1.0)
    ref = resnet_dense_ref(x.reshape(-1, input_size), params).reshape(
        batch, seq, hidden_size)

    # f32 matmul path: tight correctness check.
    prep_f32 = prepare_params(params, matmul_dtype=jnp.float32)
    out = jax.block_until_ready(resnet_dense_forward(x, prep_f32, hidden_size))
    assert out.shape == (batch, seq, hidden_size)
    err = float(jnp.max(jnp.abs(out - ref)))
    assert err < 1e-4, err

    # bf16 matmul operands (native MXU dtype), f32 accumulation: loose check.
    prep_bf16 = prepare_params(params, matmul_dtype=jnp.bfloat16)
    out_bf16 = jax.block_until_ready(resnet_dense_forward(x, prep_bf16, hidden_size))
    err_bf16 = float(jnp.max(jnp.abs(out_bf16 - ref)))
    assert err_bf16 < 5e-2, err_bf16

    # Multi-tile path: non-128-multiple features, 2 row tiles, 2 column tiles.
    input_size2, hidden_size2 = 48, 384
    rows2 = 80
    x2 = jax.random.normal(kx, (rows2, input_size2), jnp.float32)
    params2 = init_params(kp2, input_size2, hidden_size2, layer_scale_init=0.5)
    ref2 = resnet_dense_ref(x2, params2)
    prep2 = prepare_params(params2, matmul_dtype=jnp.float32)
    out2 = jax.block_until_ready(
        resnet_dense_forward(x2, prep2, hidden_size2, block_n=256))
    err2 = float(jnp.max(jnp.abs(out2 - ref2)))
    assert err2 < 5e-4, err2

    print("KERNEL_OK")
</pallas_src>

<mosaic_0001>
module attributes {stable_mosaic.version = 11 : i64} {
  func.func @_resnet_dense_kernel(%arg0: i32, %arg1: i32, %arg2: memref<8x128xf32, #tpu.memory_space<vmem>>, %arg3: memref<128x128xf32, #tpu.memory_space<vmem>>, %arg4: memref<1x128xf32, #tpu.memory_space<vmem>>, %arg5: memref<128x128xf32, #tpu.memory_space<vmem>>, %arg6: memref<1x128xf32, #tpu.memory_space<vmem>>, %arg7: memref<128x128xf32, #tpu.memory_space<vmem>>, %arg8: memref<1x128xf32, #tpu.memory_space<vmem>>, %arg9: memref<1x128xf32, #tpu.memory_space<vmem>>, %arg10: memref<8x128xf32, #tpu.memory_space<vmem>>, %arg11: memref<8x128xf32, #tpu.memory_space<vmem>>) attributes {dimension_semantics = [#tpu.dimension_semantics<parallel>, #tpu.dimension_semantics<arbitrary>], iteration_bounds = array<i64: 2, 1>, scalar_prefetch = 0 : i64, scratch_operands = 1 : i64, tpu.core_type = #tpu.core_type<tc>, window_params = [{transform_indices = @transform_0, window_bounds = array<i64: 8, 128>}, {pipeline_mode = #tpu.pipeline_mode<synchronous>, transform_indices = @transform_1, window_bounds = array<i64: 128, 128>}, {pipeline_mode = #tpu.pipeline_mode<synchronous>, transform_indices = @transform_2, window_bounds = array<i64: 1, 128>}, {transform_indices = @transform_3, window_bounds = array<i64: 128, 128>}, {transform_indices = @transform_4, window_bounds = array<i64: 1, 128>}, {transform_indices = @transform_5, window_bounds = array<i64: 128, 128>}, {transform_indices = @transform_6, window_bounds = array<i64: 1, 128>}, {transform_indices = @transform_7, window_bounds = array<i64: 1, 128>}, {transform_indices = @transform_8, window_bounds = array<i64: 8, 128>}]} {
    %c0_i32 = arith.constant 0 : i32
    %0 = arith.cmpi eq, %arg1, %c0_i32 : i32
    %1 = arith.extui %0 : i1 to i32
    %c0_i32_0 = arith.constant 0 : i32
    %2 = arith.cmpi ne, %1, %c0_i32_0 : i32
    scf.if %2 {
      %c0_18 = arith.constant 0 : index
      %c0_19 = arith.constant 0 : index
      %26 = vector.load %arg2[%c0_18, %c0_19] : memref<8x128xf32, #tpu.memory_space<vmem>>, vector<8x128xf32>
      %c0_20 = arith.constant 0 : index
      %c0_21 = arith.constant 0 : index
      %27 = vector.load %arg3[%c0_20, %c0_21] : memref<128x128xf32, #tpu.memory_space<vmem>>, vector<128x128xf32>
      %cst_22 = arith.constant dense<0.000000e+00> : vector<8x128xf32>
      %28 = tpu.matmul %26, %27, %cst_22 {dimension_numbers = #tpu.dot_dimension_numbers<[1], [0], [0], [1], [0, 0, 1, 1], [], []>} : vector<8x128xf32>, vector<128x128xf32>, vector<8x128xf32> -> vector<8x128xf32>
      %c0_23 = arith.constant 0 : index
      %c0_24 = arith.constant 0 : index
      %29 = vector.load %arg4[%c0_23, %c0_24] : memref<1x128xf32, #tpu.memory_space<vmem>>, vector<1x128xf32>
      %30 = vector.broadcast %29 : vector<1x128xf32> to vector<8x128xf32>
      %31 = arith.addf %28, %30 : vector<8x128xf32>
      %32 = arith.negf %31 : vector<8x128xf32>
      %33 = math.exp %32 : vector<8x128xf32>
      %cst_25 = arith.constant 1.000000e+00 : f32
      %34 = vector.broadcast %cst_25 : f32 to vector<8x128xf32>
      %35 = arith.addf %34, %33 : vector<8x128xf32>
      %36 = arith.divf %34, %35 : vector<8x128xf32>
      %37 = arith.mulf %31, %36 : vector<8x128xf32>
      %c0_26 = arith.constant 0 : index
      %c0_27 = arith.constant 0 : index
      %38 = vector.load %arg11[%c0_26, %c0_27] : memref<8x128xf32, #tpu.memory_space<vmem>>, vector<8x128xf32>
      tpu.vector_store %arg11[%c0_26, %c0_27], %37 {strides = array<i32>} : memref<8x128xf32, #tpu.memory_space<vmem>>, vector<8x128xf32>,
    } else {
    }
    %c0 = arith.constant 0 : index
    %c0_1 = arith.constant 0 : index
    %3 = vector.load %arg2[%c0, %c0_1] : memref<8x128xf32, #tpu.memory_space<vmem>>, vector<8x128xf32>
    %c0_2 = arith.constant 0 : index
    %c0_3 = arith.constant 0 : index
    %4 = vector.load %arg5[%c0_2, %c0_3] : memref<128x128xf32, #tpu.memory_space<vmem>>, vector<128x128xf32>
    %cst = arith.constant dense<0.000000e+00> : vector<8x128xf32>
    %5 = tpu.matmul %3, %4, %cst {dimension_numbers = #tpu.dot_dimension_numbers<[1], [0], [0], [1], [0, 0, 1, 1], [], []>} : vector<8x128xf32>, vector<128x128xf32>, vector<8x128xf32> -> vector<8x128xf32>
    %c0_4 = arith.constant 0 : index
    %c0_5 = arith.constant 0 : index
    %6 = vector.load %arg6[%c0_4, %c0_5] : memref<1x128xf32, #tpu.memory_space<vmem>>, vector<1x128xf32>
    %7 = vector.broadcast %6 : vector<1x128xf32> to vector<8x128xf32>
    %8 = arith.addf %5, %7 : vector<8x128xf32>
    %c0_6 = arith.constant 0 : index
    %c0_7 = arith.constant 0 : index
    %9 = vector.load %arg11[%c0_6, %c0_7] : memref<8x128xf32, #tpu.memory_space<vmem>>, vector<8x128xf32>
    %c0_8 = arith.constant 0 : index
    %c0_9 = arith.constant 0 : index
    %10 = vector.load %arg7[%c0_8, %c0_9] : memref<128x128xf32, #tpu.memory_space<vmem>>, vector<128x128xf32>
    %cst_10 = arith.constant dense<0.000000e+00> : vector<8x128xf32>
    %11 = tpu.matmul %9, %10, %cst_10 {dimension_numbers = #tpu.dot_dimension_numbers<[1], [0], [0], [1], [0, 0, 1, 1], [], []>} : vector<8x128xf32>, vector<128x128xf32>, vector<8x128xf32> -> vector<8x128xf32>
    %c0_11 = arith.constant 0 : index
    %c0_12 = arith.constant 0 : index
    %12 = vector.load %arg8[%c0_11, %c0_12] : memref<1x128xf32, #tpu.memory_space<vmem>>, vector<1x128xf32>
    %13 = vector.broadcast %12 : vector<1x128xf32> to vector<8x128xf32>
    %14 = arith.addf %11, %13 : vector<8x128xf32>
    %15 = arith.negf %14 : vector<8x128xf32>
    %16 = math.exp %15 : vector<8x128xf32>
    %cst_13 = arith.constant 1.000000e+00 : f32
    %17 = vector.broadcast %cst_13 : f32 to vector<8x128xf32>
    %18 = arith.addf %17, %16 : vector<8x128xf32>
    %19 = arith.divf %17, %18 : vector<8x128xf32>
    %20 = arith.mulf %14, %19 : vector<8x128xf32>
    %c0_14 = arith.constant 0 : index
    %c0_15 = arith.constant 0 : index
    %21 = vector.load %arg9[%c0_14, %c0_15] : memref<1x128xf32, #tpu.memory_space<vmem>>, vector<1x128xf32>
    %22 = vector.broadcast %21 : vector<1x128xf32> to vector<8x128xf32>
    %23 = arith.mulf %22, %20 : vector<8x128xf32>
    %24 = arith.addf %8, %23 : vector<8x128xf32>
    %c0_16 = arith.constant 0 : index
    %c0_17 = arith.constant 0 : index
    %25 = vector.load %arg10[%c0_16, %c0_17] : memref<8x128xf32, #tpu.memory_space<vmem>>, vector<8x128xf32>
    tpu.vector_store %arg10[%c0_16, %c0_17], %24 {strides = array<i32>} : memref<8x128xf32, #tpu.memory_space<vmem>>, vector<8x128xf32>,
    return
  }
  func.func @transform_0(%arg0: i32, %arg1: i32) -> (i32, i32) {
    %c0_i32 = arith.constant 0 : i32
    %c0_i32_0 = arith.constant 0 : i32
    return %arg0, %c0_i32 : i32, i32
  }
  func.func @transform_1(%arg0: i32, %arg1: i32) -> (i32, i32) {
    %c0_i32 = arith.constant 0 : i32
    %c0_i32_0 = arith.constant 0 : i32
    %c0_i32_1 = arith.constant 0 : i32
    return %c0_i32, %c0_i32_0 : i32, i32
  }
  func.func @transform_2(%arg0: i32, %arg1: i32) -> (i32, i32) {
    %c0_i32 = arith.constant 0 : i32
    %c0_i32_0 = arith.constant 0 : i32
    %c0_i32_1 = arith.constant 0 : i32
    return %c0_i32, %c0_i32_0 : i32, i32
  }
  func.func @transform_3(%arg0: i32, %arg1: i32) -> (i32, i32) {
    %c0_i32 = arith.constant 0 : i32
    %c0_i32_0 = arith.constant 0 : i32
    return %c0_i32, %arg1 : i32, i32
  }
  func.func @transform_4(%arg0: i32, %arg1: i32) -> (i32, i32) {
    %c0_i32 = arith.constant 0 : i32
    %c0_i32_0 = arith.constant 0 : i32
    return %c0_i32, %arg1 : i32, i32
  }
  func.func @transform_5(%arg0: i32, %arg1: i32) -> (i32, i32) {
    %c0_i32 = arith.constant 0 : i32
    %c0_i32_0 = arith.constant 0 : i32
    return %c0_i32, %arg1 : i32, i32
  }
  func.func @transform_6(%arg0: i32, %arg1: i32) -> (i32, i32) {
    %c0_i32 = arith.constant 0 : i32
    %c0_i32_0 = arith.constant 0 : i32
    return %c0_i32, %arg1 : i32, i32
  }
  func.func @transform_7(%arg0: i32, %arg1: i32) -> (i32, i32) {
    %c0_i32 = arith.constant 0 : i32
    %c0_i32_0 = arith.constant 0 : i32
    return %c0_i32, %arg1 : i32, i32
  }
  func.func @transform_8(%arg0: i32, %arg1: i32) -> (i32, i32) {
    %c0_i32 = arith.constant 0 : i32
    return %arg0, %arg1 : i32, i32
  }
}

</mosaic_0001>

<bundles_post_ra>
// kernel: resnet_dense_forward.1
= control target key start
LH: loop header
LB: loop body
LE: loop exit
PB: predicated region body
PF: predicated region fallthrough
CT: control target
= control target key end

     0   :  { %13 = vsyncpa [#allocation4], 0  ;;  %s1108_s0 = inlined_call_operand.vmem [shape: f32[16,128], index: 0, kind: input, shape index: {}]   ;;  %s1109_s1 = inlined_call_operand.hbm [shape: f32[128,128], index: 1, kind: input, shape index: {}]   ;;  %s1110_s2 = inlined_call_operand.vmem [shape: f32[1,128], index: 2, kind: input, shape index: {}]   ;;  %s1111_s3 = inlined_call_operand.hbm [shape: f32[128,128], index: 3, kind: input, shape index: {}]   ;;  %s1112_s4 = inlined_call_operand.vmem [shape: f32[1,128], index: 4, kind: input, shape index: {}]   ;;  %s1113_s5 = inlined_call_operand.hbm [shape: f32[128,128], index: 5, kind: input, shape index: {}]   ;;  %s1114_s6 = inlined_call_operand.vmem [shape: f32[1,128], index: 6, kind: input, shape index: {}]   ;;  %s1115_s7 = inlined_call_operand.vmem [shape: f32[1,128], index: 7, kind: input, shape index: {}]   ;;  %s1116_s8 = inlined_call_operand.vmem [shape: f32[16,128], index: 8, kind: output, shape index: {}]  }
   0x1   :  { %14 = vsyncpa [#allocation6], 0  ;;  %s1006_s27 = smov 0   ;;  %s1008_s28 = smov 0  }
   0x2   :  { %s1010_s29 = smov 0  }
   0x3 LB: > { %s745_s30 = sadd.s32 4294967295, %s954_s29   ;;  %p747_p0 = scmp.ge.s32.totalorder %s954_s29, 1  ;;  %s954_s29 = sphi %s1010_s29, %s20_s29   ;;  %s950_s28 = sphi %s1008_s28, %s1121_s28   ;;  %s946_s27 = sphi %s1006_s27, %s1120_s27  }
   0x4   : > { %p263_p1 = scmp.lt.s32.totalorder %s954_s29, 3  ;;  %p1024_p2 = scmp.eq.s32.totalorder %s745_s30, 0 }
   0x5   : > { %s293_s12 = sshll.u32 %s1111_s3, 4  ;;  %s956_s14 = smov [#allocation5]   ;;  %s294_s12 = int_to_ptr.hbm [resolvable:$true] %s293_s12 }
   0x6   : > { %p1031_p3 = pnand %p747_p0, %p263_p1  ;;  %s295_s15 = sshll.u32 %s956_s14, 4  ;;  %s296_s15 = int_to_ptr.vmem [resolvable:$true] %s295_s15 }
   0x7   : > { %s32_s17 = sadd.s32 1, %s950_s28  ;;  %s957_s18 = smov 128  }
   0x8   : > { %p777_p4 = pneg %p1031_p3  ;;  %p34_p6 = scmp.ge.s32.totalorder %s32_s17, 2 }
   0x9   : > { %s958_s19 = smov 8   ;;  %s274_s22 = sshll.u32 %s1109_s1, 4  ;;  %s275_s22 = int_to_ptr.hbm [resolvable:$true] %s274_s22 }
   0xa   : > { %p1039_p5 = pnand %p1024_p2, %p777_p4  ;;  %s1123_s17 = smov (%p34_p6, %s32_s17), 0 }
   0xb   : > { %s959_s23 = smov [#allocation3]   ;;  %s315_s30 = sshll.u32 %s1113_s5, 4  ;;  %s316_s30 = int_to_ptr.hbm [resolvable:$true] %s315_s30 }
   0xc   : > { %783 = dma.hbm_to_vmem [thread:$0]  (!%p1039_p5), %s294_s12, 2048, %s296_s15, [#allocation6], %s957_s18, %s957_s18, %s958_s19  }
   0xd   : > { %s276_s24 = sshll.u32 %s959_s23, 4  ;;  %s960_s10 = smov [#allocation7]   ;;  %s277_s24 = int_to_ptr.vmem [resolvable:$true] %s276_s24 }
   0xe   : > { %780 = dma.hbm_to_vmem [thread:$0]  (!%p1039_p5), %s275_s22, 2048, %s277_s24, [#allocation4], %s957_s18, %s957_s18, %s958_s19  }
   0xf   : > { %s317_s11 = sshll.u32 %s960_s10, 4  ;;  %352 = sbr.rel (%p1031_p3) target bundleno = 382 (0x17e), region = 52  ;;  %s318_s11 = int_to_ptr.vmem [resolvable:$true] %s317_s11 }
  0x10   : > { %786 = dma.hbm_to_vmem [thread:$0]  (!%p1039_p5), %s316_s30, 2048, %s318_s11, [#allocation6], %s957_s18, %s957_s18, %s958_s19  }
  0x14   : > { %937 = dma.done.wait (%p1024_p2), [#allocation4], 2048  }
  0x15   : > { %939 = vsyncadd (%p1024_p2), [#allocation4], 4294965248 }
  0x16   : > { %941 = dma.done.wait (%p1024_p2), [#allocation6], 4096  }
  0x17   : > { %943 = vsyncadd (%p1024_p2), [#allocation6], 4294963200  ;;  %v447_v0 = vld [vmem:[#allocation3 + $0x78] sm:$0xff]  ;;  %v446_v1 = vld [vmem:[#allocation3 + $0x70] sm:$0xff]  ;;  %p407_p7 = scmp.lt.s32.totalorder %s946_s27, 1 }
  0x18   : > { %452 = vmatpush.msra.mxu0 %v447_v0  ;;  %v445_v2 = vld [vmem:[#allocation3 + $0x68] sm:$0xff]  ;;  %v444_v3 = vld [vmem:[#allocation3 + $0x60] sm:$0xff]  ;;  %v443_v4 = vld [vmem:[#allocation3 + $0x58] sm:$0xff] }
  0x19   : > { %v442_v5 = vld [vmem:[#allocation3 + $0x50] sm:$0xff]  ;;  %v441_v6 = vld [vmem:[#allocation3 + $0x48] sm:$0xff]  ;;  %v440_v7 = vld [vmem:[#allocation3 + $0x40] sm:$0xff]  ;;  %s1125_s27 = smov (!%p407_p7, %s946_s27), 1 }
  0x1a   : > { %453 = vmatpush.msra.mxu0 %v446_v1  ;;  %v439_v8 = vld [vmem:[#allocation3 + $0x38] sm:$0xff]  ;;  %v438_v9 = vld [vmem:[#allocation3 + $0x30] sm:$0xff]  ;;  %v437_v10 = vld [vmem:[#allocation3 + $0x28] sm:$0xff]  ;;  %s759_s9 = sshll.u32 %s1125_s27, 3 }
  0x1b   : > { %v436_v11 = vld [vmem:[#allocation3 + $0x20] sm:$0xff]  ;;  %v435_v12 = vld [vmem:[#allocation3 + $0x18] sm:$0xff]  ;;  %v434_v13 = vld [vmem:[#allocation3 + $0x10] sm:$0xff]  ;;  %s410_s14 = scalar_lea.vmem %s1108_s0, %s759_s9  ;;  %s426_s26 = scalar_lea.vmem %s1116_s8, %s759_s9 }
  0x1c   : > { %454 = vmatpush.msra.mxu0 %v445_v2  ;;  %v433_v14 = vld [vmem:[#allocation3 + $0x8] sm:$0xff]  ;;  %v432_v15 = vld [vmem:[#allocation3] sm:$0xff]  ;;  %v550_v17 = vld [vmem:[#allocation7 + $0x78] sm:$0xff] }
  0x1d   : > { %v1078_v16 = vld [vmem:[%s410_s14] sm:$0xff]  ;;  %555 = vmatpush.msra.mxu2 %v550_v17  ;;  %v549_v18 = vld [vmem:[#allocation7 + $0x70] sm:$0xff]  ;;  %v548_v19 = vld [vmem:[#allocation7 + $0x68] sm:$0xff] }
  0x1e   : > { %455 = vmatpush.msra.mxu0 %v444_v3  ;;  %v547_v20 = vld [vmem:[#allocation7 + $0x60] sm:$0xff]  ;;  %v546_v21 = vld [vmem:[#allocation7 + $0x58] sm:$0xff]  ;;  %v545_v22 = vld [vmem:[#allocation7 + $0x50] sm:$0xff] }
  0x1f   : > { %556 = vmatpush.msra.mxu2 %v549_v18  ;;  %v544_v23 = vld [vmem:[#allocation7 + $0x48] sm:$0xff]  ;;  %v543_v24 = vld [vmem:[#allocation7 + $0x40] sm:$0xff]  ;;  %v542_v25 = vld [vmem:[#allocation7 + $0x38] sm:$0xff] }
  0x20   : > { %456 = vmatpush.msra.mxu0 %v443_v4  ;;  %v541_v26 = vld [vmem:[#allocation7 + $0x30] sm:$0xff]  ;;  %v540_v27 = vld [vmem:[#allocation7 + $0x28] sm:$0xff]  ;;  %v539_v28 = vld [vmem:[#allocation7 + $0x20] sm:$0xff] }
  0x21   : > { %557 = vmatpush.msra.mxu2 %v548_v19  ;;  %v538_v29 = vld [vmem:[#allocation7 + $0x18] sm:$0xff]  ;;  %v537_v30 = vld [vmem:[#allocation7 + $0x10] sm:$0xff]  ;;  %v536_v31 = vld [vmem:[#allocation7 + $0x8] sm:$0xff] }
  0x22   : > { %457 = vmatpush.msra.mxu0 %v442_v5  ;;  %v822_v32 = vld [vmem:[%s1110_s2] ss:$0 sm:$0xff]  ;;  %v509_v36 = vld [vmem:[#allocation5 + $0x78] sm:$0xff]  ;;  %v508_v37 = vld [vmem:[#allocation5 + $0x70] sm:$0xff] }
  0x23   : > { %558 = vmatpush.msra.mxu2 %v547_v20  ;;  %v535_v33 = vld [vmem:[#allocation7] sm:$0xff]  ;;  %514 = vmatpush.msra.mxu1 %v509_v36  ;;  %v507_v39 = vld [vmem:[#allocation5 + $0x68] sm:$0xff]  ;;  %v505_v41 = vld [vmem:[#allocation5 + $0x58] sm:$0xff] }
  0x24   : > { %458 = vmatpush.msra.mxu0 %v441_v6  ;;  %v506_v40 = vld [vmem:[#allocation5 + $0x60] sm:$0xff]  ;;  %v504_v42 = vld [vmem:[#allocation5 + $0x50] sm:$0xff]  ;;  %v503_v44 = vld [vmem:[#allocation5 + $0x48] sm:$0xff] }
  0x25   : > { %559 = vmatpush.msra.mxu2 %v546_v21  ;;  %515 = vmatpush.msra.mxu1 %v508_v37  ;;  %v502_v46 = vld [vmem:[#allocation5 + $0x40] sm:$0xff]  ;;  %v501_v47 = vld [vmem:[#allocation5 + $0x38] sm:$0xff]  ;;  %v500_v48 = vld [vmem:[#allocation5 + $0x30] sm:$0xff] }
  0x26   : > { %459 = vmatpush.msra.mxu0 %v440_v7  ;;  %v499_v49 = vld [vmem:[#allocation5 + $0x28] sm:$0xff]  ;;  %v498_v52 = vld [vmem:[#allocation5 + $0x20] sm:$0xff]  ;;  %v497_v54 = vld [vmem:[#allocation5 + $0x18] sm:$0xff] }
  0x27   : > { %560 = vmatpush.msra.mxu2 %v545_v22  ;;  %516 = vmatpush.msra.mxu1 %v507_v39  ;;  %v496_v58 = vld [vmem:[#allocation5 + $0x10] sm:$0xff]  ;;  %v495_v60 = vld [vmem:[#allocation5 + $0x8] sm:$0xff]  ;;  %v494_v63 = vld [vmem:[#allocation5] sm:$0xff] }
  0x28   : > { %460 = vmatpush.msra.mxu0 %v439_v8  ;;  %v823_v2 = vld [vmem:[%s1114_s6] ss:$0 sm:$0xff] }
  0x29   : > { %561 = vmatpush.msra.mxu2 %v544_v23  ;;  %517 = vmatpush.msra.mxu1 %v506_v40  ;;  %v825_v19 = vld [vmem:[%s1115_s7] ss:$0 sm:$0xff] }
  0x2a   : > { %461 = vmatpush.msra.mxu0 %v438_v9 }
  0x2b   : > { %562 = vmatpush.msra.mxu2 %v543_v24  ;;  %518 = vmatpush.msra.mxu1 %v505_v41 }
  0x2c   : > { %462 = vmatpush.msra.mxu0 %v437_v10 }
  0x2d   : > { %563 = vmatpush.msra.mxu2 %v542_v25  ;;  %519 = vmatpush.msra.mxu1 %v504_v42 }
  0x2e   : > { %463 = vmatpush.msra.mxu0 %v436_v11 }
  0x2f   : > { %564 = vmatpush.msra.mxu2 %v541_v26  ;;  %520 = vmatpush.msra.mxu1 %v503_v44 }
  0x30   : > { %464 = vmatpush.msra.mxu0 %v435_v12 }
  0x31   : > { %565 = vmatpush.msra.mxu2 %v540_v27  ;;  %521 = vmatpush.msra.mxu1 %v502_v46 }
  0x32   : > { %465 = vmatpush.msra.mxu0 %v434_v13 }
  0x33   : > { %566 = vmatpush.msra.mxu2 %v539_v28  ;;  %522 = vmatpush.msra.mxu1 %v501_v47 }
  0x34   : > { %466 = vmatpush.msra.mxu0 %v433_v14 }
  0x35   : > { %567 = vmatpush.msra.mxu2 %v538_v29  ;;  %523 = vmatpush.msra.mxu1 %v500_v48 }
  0x36   : > { %467 = vmatpush.msra.mxu0 %v432_v15  ;;  %v824_v15 = vld [vmem:[%s1112_s4] ss:$0 sm:$0xff] }
  0x37   : > { %468 = vmatmul.f32.vlgmr.msra.gmra.mxu0 %v1078_v16  ;;  %568 = vmatpush.msra.mxu2 %v537_v30 }
  0x38   : > { %524 = vmatpush.msra.mxu1 %v499_v49 }
  0x39   : > { %569 = vmatpush.msra.mxu2 %v536_v31 }
  0x3a   : > { %525 = vmatpush.msra.mxu1 %v498_v52 }
  0x3b   : > { %570 = vmatpush.msra.mxu2 %v535_v33 }
  0x3c   : > { %526 = vmatpush.msra.mxu1 %v497_v54 }
  0x3e   : > { %527 = vmatpush.msra.mxu1 %v496_v58 }
  0x40   : > { %528 = vmatpush.msra.mxu1 %v495_v60 }
  0x42   : > { %529 = vmatpush.msra.mxu1 %v494_v63 }
  0x43   : > { %530 = vmatmul.f32.vlgmr.msra.gmra.mxu1 %v1078_v16 }
  0xb4   : > { %v469_v34 = vpop.f32.mrf.mxu0 }
  0xb5   : > { %v470_v35 = vadd.f32 %v822_v32, %v469_v34 }
  0xb7   : > { %v761_v38 = vmul.f32 -1.442695, %v470_v35 }
  0xb9   : > { %826 = vpow2.f32 %v761_v38 }
  0xbf   : > { %v827_v43 = vpop.eup %826 }
  0xc0   : > { %v475_v45 = vadd.f32 1.0, %v827_v43  ;;  %v531_v17 = vpop.f32.mrf.mxu1 }
  0xc1   : > { %v532_v22 = vadd.f32 %v824_v15, %v531_v17 }
  0xc2   : > { %828 = vrcp.f32 %v475_v45  ;;  %v487_v55 = vand.u32 2147483648, %v475_v45  ;;  %v485_v57 = vand.u32 2147483647, %v475_v45  ;;  %vm481_vm1 = vweird.f32 %v475_v45 }
  0xc4   : > { %v488_v61 = vor.u32 1.1754944e-38, %v487_v55  ;;  %vm486_vm3 = vcmp.eq.f32.partialorder %v485_v57, 8.507059e+37 }
  0xc8   : > { %v829_v50 = vpop.eup %828 }
  0xc9   : > { %v477_v51 = vmul.f32 %v829_v50, %v475_v45  ;;  %vm482_vm0 = vweird.f32 %v829_v50 }
  0xca   : > { %vm483_vm2 = vmor %vm481_vm1, %vm482_vm0 }
  0xcb   : > { %v478_v53 = vsub.f32 1.0, %v477_v51 }
  0xcd   : > { %v479_v56 = vmul.f32 %v829_v50, %v478_v53 }
  0xcf   : > { %v480_v59 = vadd.f32 %v829_v50, %v479_v56 }
  0xd1   : > { %v484_v62 = vsel %vm483_vm2, %v829_v50, %v480_v59 }
  0xd2   : > { %v489_v0 = vsel %vm486_vm3, %v488_v61, %v484_v62 }
  0xd3   : > { %v491_v1 = vmul.f32 %v489_v0, %v470_v35 }
  0xd5   : > { %571 = vmatmul.f32.vlgmr.msra.gmra.mxu2 %v491_v1 }
 0x158   : > { %v572_v3 = vpop.f32.mrf.mxu2 }
 0x159   : > { %v573_v4 = vadd.f32 %v823_v2, %v572_v3 }
 0x15b   : > { %v762_v5 = vmul.f32 -1.442695, %v573_v4 }
 0x15d   : > { %830 = vpow2.f32 %v762_v5 }
 0x163   : > { %v831_v6 = vpop.eup %830 }
 0x164   : > { %v578_v7 = vadd.f32 1.0, %v831_v6 }
 0x166   : > { %832 = vrcp.f32 %v578_v7  ;;  %v590_v11 = vand.u32 2147483648, %v578_v7  ;;  %v588_v13 = vand.u32 2147483647, %v578_v7  ;;  %vm584_vm5 = vweird.f32 %v578_v7 }
 0x168   : > { %v591_v16 = vor.u32 1.1754944e-38, %v590_v11  ;;  %vm589_vm7 = vcmp.eq.f32.partialorder %v588_v13, 8.507059e+37 }
 0x16c   : > { %v833_v8 = vpop.eup %832 }
 0x16d   : > { %v580_v9 = vmul.f32 %v833_v8, %v578_v7  ;;  %vm585_vm4 = vweird.f32 %v833_v8 }
 0x16e   : > { %vm586_vm6 = vmor %vm584_vm5, %vm585_vm4 }
 0x16f   : > { %v581_v10 = vsub.f32 1.0, %v580_v9 }
 0x171   : > { %v582_v12 = vmul.f32 %v833_v8, %v581_v10 }
 0x173   : > { %v583_v14 = vadd.f32 %v833_v8, %v582_v12 }
 0x175   : > { %v587_v18 = vsel %vm586_vm6, %v833_v8, %v583_v14 }
 0x176   : > { %v592_v20 = vsel %vm589_vm7, %v591_v16, %v587_v18 }
 0x177   : > { %v594_v21 = vmul.f32 %v592_v20, %v573_v4 }
 0x179   : > { %v599_v23 = vmul.f32 %v825_v19, %v594_v21 }
 0x17b   : > { %v600_v24 = vadd.f32 %v599_v23, %v532_v22 }
 0x17d   : > { %601 = vst [vmem:[%s426_s26] sm:$0xff] %v600_v24 }
 0x17e PF: > { %s20_s29 = sadd.s32 1, %s954_s29   ;;  %s1120_s27 = smov %s950_s28 }
 0x17f   : > { %p17_p8 = scmp.ge.s32.totalorder %s20_s29, 4   ;;  %s1121_s28 = smov %s1123_s17 }
 0x181   :  { %19 = sbr.rel (!%p17_p8) target bundleno = 3 (0x3), region = 110 }
 0x186   :  { %627 = vsyncpa [#allocation4], 1 }
 0x187   :  { %629 = vsyncpa [#allocation4 + $0x1], 1 }
 0x188   :  { %630 = vsyncpa [#allocation6], 1 }

</bundles_post_ra>
